<compile_context>
chip_gen: v5e
topology: v5e:2x2
jax: 0.10.0
libtpu: 0.0.40
codegen_flags: <defaults>
</compile_context>

<pallas_src>
import functools

import numpy as np
import jax
import jax.numpy as jnp
from jax.experimental import pallas as pl
from jax.experimental.pallas import tpu as pltpu

BN_EPS = 1e-5


def _round_up(x, m):
    return (x + m - 1) // m * m


def _vmem_capacity_bytes():
    try:
        return int(pltpu.get_tpu_info().vmem_capacity_bytes)
    except Exception:
        return 64 * 1024 * 1024  # conservative default: v7x per-TC VMEM


def _linear_block_kernel(x_ref, w_ref, gb_ref, o_ref, acc_ref, *,
                         n_rows, tk, x_resident, batch_norm):
    """One (out-tile j, k-tile k) grid step.

    x_ref:   (N_pad, K_pad) if x_resident else (N_pad, TK)   activations
    w_ref:   (TK, TN)   pre-transposed, zero-padded weight tile
    gb_ref:  (2, TN)    row 0 = gamma (or bias when no BN), row 1 = beta
    o_ref:   (N_pad, TN)
    acc_ref: (N_pad, TN) f32 accumulator scratch (persists across the K axis)
    """
    k = pl.program_id(1)

    @pl.when(k == 0)
    def _init():
        acc_ref[...] = jnp.zeros_like(acc_ref)

    if x_resident:
        k0 = pl.multiple_of(k * tk, tk)
        x_blk = x_ref[:, pl.ds(k0, tk)]
    else:
        x_blk = x_ref[...]

    # MXU matmul at the fed dtype (bf16 if cast_to_bf16), f32 accumulation.
    acc_ref[...] += jnp.dot(x_blk, w_ref[...],
                            preferred_element_type=jnp.float32)

    @pl.when(k == pl.num_programs(1) - 1)
    def _finalize():
        y = acc_ref[...]
        if batch_norm:
            # Training-mode BatchNorm1d statistics over the true n_rows batch
            # rows. Padded rows of x are all-zero and the linear bias is folded
            # away, so padded rows contribute exactly 0 to sum / sum-of-squares.
            inv_n = jnp.float32(1.0 / n_rows)
            mean = jnp.sum(y, axis=0, keepdims=True) * inv_n
            var = jnp.sum(y * y, axis=0, keepdims=True) * inv_n - mean * mean
            var = jnp.maximum(var, 0.0)  # guard f32 cancellation
            gamma = gb_ref[0:1, :].astype(jnp.float32)
            beta = gb_ref[1:2, :].astype(jnp.float32)
            scale = gamma * jax.lax.rsqrt(var + BN_EPS)
            shift = beta - mean * scale
            out = y * scale + shift
        else:
            out = y + gb_ref[0:1, :].astype(jnp.float32)  # linear bias
        o_ref[...] = jnp.maximum(out, 0.0).astype(o_ref.dtype)


def make_linear_block(weight, bias, gamma=None, beta=None, *,
                      batch_norm=True, cast_to_bf16=False):
    """Build the fused forward. weight: (out_f, in_f) PyTorch convention.

    Parameter prep (transpose + pad + optional bf16 cast) happens once here.
    With training-mode BatchNorm the linear bias cancels exactly
    ((y+b) - mean(y+b) == y - mean(y)) and is dropped; without BN it is kept
    and applied in the fused epilogue.
    """
    out_f, in_f = weight.shape

    # ---- static tile plan (batch-size independent, MXU / lane aligned) ----
    k128 = _round_up(in_f, 128)
    o128 = _round_up(out_f, 128)
    # TK: largest of (512, 256, 128) that divides the 128-padded K extent.
    tk = next(c for c in (512, 256, 128) if k128 % c == 0)
    # TN: 256 (v6e/v7x MXU width) only when that still leaves >= 2 j tiles so
    # the "parallel" axis can shard across v7x's two TensorCores; else 128.
    tn = 256 if (o128 % 256 == 0 and o128 // 256 >= 2) else 128
    k_pad = _round_up(in_f, tk)
    out_pad = _round_up(out_f, tn)

    # ---- one-time parameter prep ----
    w_dtype = jnp.bfloat16 if (cast_to_bf16 and weight.dtype == jnp.float32) else weight.dtype
    w_t = (jnp.zeros((k_pad, out_pad), w_dtype)
           .at[:in_f, :out_f].set(weight.T.astype(w_dtype)))

    gb = jnp.zeros((2, out_pad), jnp.float32)
    if batch_norm:
        gb = gb.at[0, :out_f].set(gamma.astype(jnp.float32))
        gb = gb.at[1, :out_f].set(beta.astype(jnp.float32))
        # linear bias dropped: exact no-op under training-mode BatchNorm
    else:
        if bias is not None:
            gb = gb.at[0, :out_f].set(bias.astype(jnp.float32))

    # ---- per-generation VMEM budget (v7x 64 MiB, v5e/v6e 128 MiB) ----
    vmem_cap = _vmem_capacity_bytes()
    vmem_limit = int(vmem_cap * 0.75)
    vmem_budget = vmem_limit - (2 << 20)  # headroom for compiler scratch

    w_item = np.dtype(w_t.dtype).itemsize

    def forward(x):
        n = x.shape[0]
        x_feed_dtype = jnp.bfloat16 if (cast_to_bf16 and x.dtype == jnp.float32) else x.dtype
        x_item = np.dtype(x_feed_dtype).itemsize
        out_item = np.dtype(x.dtype).itemsize
        sublane = {1: 32, 2: 16}.get(x_item, 8)
        n_pad = _round_up(n, sublane)

        # Conditional padding: skip the extra HBM pad round-trip when aligned.
        if n_pad == n and k_pad == in_f and x_item == np.dtype(x.dtype).itemsize:
            x_p = x
        elif n_pad == n and k_pad == in_f:
            x_p = x.astype(x_feed_dtype)
        else:
            x_p = (jnp.zeros((n_pad, k_pad), x_feed_dtype)
                   .at[:n, :in_f].set(x.astype(x_feed_dtype)))

        # Keep x fully VMEM-resident across the whole grid when it fits: x is
        # then DMA'd from HBM exactly once (constant index_map). The 2x on x is
        # a conservative allowance for the pipeline's buffer count.
        resident_bytes = (2 * n_pad * k_pad * x_item      # x (resident)
                          + n_pad * tn * 4                # acc scratch
                          + 2 * n_pad * tn * out_item     # output (dbl-buffered)
                          + 2 * tk * tn * w_item          # W tiles (dbl-buffered)
                          + 2 * 2 * tn * 4)               # gamma/beta slab
        x_resident = resident_bytes <= vmem_budget
        # TODO(synk): when even the streamed-x scheme exceeds VMEM (very large
        # n_pad), switch to a two-pass sum/sumsq reduction over an N grid axis.

        if x_resident:
            x_spec = pl.BlockSpec((n_pad, k_pad), lambda j, k: (0, 0))
        else:
            x_spec = pl.BlockSpec((n_pad, tk), lambda j, k: (0, k))

        kernel = functools.partial(
            _linear_block_kernel, n_rows=n, tk=tk,
            x_resident=x_resident, batch_norm=batch_norm)

        out = pl.pallas_call(
            kernel,
            out_shape=jax.ShapeDtypeStruct((n_pad, out_pad), x.dtype),
            grid_spec=pltpu.PrefetchScalarGridSpec(
                num_scalar_prefetch=0,
                grid=(out_pad // tn, k_pad // tk),
                in_specs=[
                    x_spec,                                            # x
                    pl.BlockSpec((tk, tn), lambda j, k: (k, j)),       # W^T
                    pl.BlockSpec((2, tn), lambda j, k: (0, j)),        # gamma/beta
                ],
                out_specs=pl.BlockSpec((n_pad, tn), lambda j, k: (0, j)),
                scratch_shapes=[pltpu.VMEM((n_pad, tn), jnp.float32)],
            ),
            compiler_params=pltpu.CompilerParams(
                dimension_semantics=("parallel", "arbitrary"),
                vmem_limit_bytes=vmem_limit,
            ),
        )(x_p, w_t, gb)

        if n_pad == n and out_pad == out_f:
            return out
        return out[:n, :out_f]

    return forward


if __name__ == "__main__":
    key = jax.random.PRNGKey(0)
    k_x, k_w, k_b = jax.random.split(key, 3)

    N, IN_F, OUT_F = 8, 32, 16

    x = jax.random.normal(k_x, (N, IN_F), dtype=jnp.float32)

    # PyTorch-style default Linear init; BatchNorm1d init (gamma=1, beta=0).
    bound = 1.0 / (IN_F ** 0.5)
    weight = jax.random.uniform(k_w, (OUT_F, IN_F), jnp.float32, -bound, bound)
    bias = jax.random.uniform(k_b, (OUT_F,), jnp.float32, -bound, bound)
    gamma = jnp.ones((OUT_F,), jnp.float32)
    beta = jnp.zeros((OUT_F,), jnp.float32)

    # --- batch_norm=True path: Linear -> BatchNorm1d(train) -> ReLU ---
    fwd_bn = jax.jit(make_linear_block(weight, bias, gamma, beta, batch_norm=True))
    out_bn = jax.block_until_ready(fwd_bn(x))

    y = x @ weight.T + bias
    m = y.mean(axis=0, keepdims=True)
    v = ((y - m) ** 2).mean(axis=0, keepdims=True)
    ref_bn = jnp.maximum((y - m) / jnp.sqrt(v + BN_EPS) * gamma + beta, 0.0)

    assert out_bn.shape == (N, OUT_F)
    assert jnp.allclose(out_bn, ref_bn, atol=1e-4, rtol=1e-4), \
        float(jnp.max(jnp.abs(out_bn - ref_bn)))

    # --- batch_norm=False path: Linear -> ReLU ---
    fwd_nobn = jax.jit(make_linear_block(weight, bias, gamma, beta, batch_norm=False))
    out_nobn = jax.block_until_ready(fwd_nobn(x))
    ref_nobn = jnp.maximum(x @ weight.T + bias, 0.0)
    assert out_nobn.shape == (N, OUT_F)
    assert jnp.allclose(out_nobn, ref_nobn, atol=1e-4, rtol=1e-4), \
        float(jnp.max(jnp.abs(out_nobn - ref_nobn)))

    print("KERNEL_OK")
</pallas_src>

<mosaic_0001>
module attributes {stable_mosaic.version = 11 : i64} {
  func.func @_linear_block_kernel(%arg0: i32, %arg1: i32, %arg2: memref<8x128xf32, #tpu.memory_space<vmem>>, %arg3: memref<128x128xf32, #tpu.memory_space<vmem>>, %arg4: memref<2x128xf32, #tpu.memory_space<vmem>>, %arg5: memref<8x128xf32, #tpu.memory_space<vmem>>, %arg6: memref<8x128xf32, #tpu.memory_space<vmem>>) attributes {dimension_semantics = [#tpu.dimension_semantics<parallel>, #tpu.dimension_semantics<arbitrary>], iteration_bounds = array<i64: 1, 1>, scalar_prefetch = 0 : i64, scratch_operands = 1 : i64, tpu.core_type = #tpu.core_type<tc>, window_params = [{pipeline_mode = #tpu.pipeline_mode<synchronous>, transform_indices = @transform_0, window_bounds = array<i64: 8, 128>}, {transform_indices = @transform_1, window_bounds = array<i64: 128, 128>}, {transform_indices = @transform_2, window_bounds = array<i64: 2, 128>}, {transform_indices = @transform_3, window_bounds = array<i64: 8, 128>}]} {
    %c0_i32 = arith.constant 0 : i32
    %0 = arith.cmpi eq, %arg1, %c0_i32 : i32
    %1 = arith.extui %0 : i1 to i32
    %c0_i32_0 = arith.constant 0 : i32
    %2 = arith.cmpi ne, %1, %c0_i32_0 : i32
    scf.if %2 {
      %cst_9 = arith.constant 0.000000e+00 : f32
      %15 = vector.broadcast %cst_9 : f32 to vector<8x128xf32>
      %c0_10 = arith.constant 0 : index
      %c0_11 = arith.constant 0 : index
      %16 = vector.load %arg6[%c0_10, %c0_11] : memref<8x128xf32, #tpu.memory_space<vmem>>, vector<8x128xf32>
      tpu.vector_store %arg6[%c0_10, %c0_11], %15 {strides = array<i32>} : memref<8x128xf32, #tpu.memory_space<vmem>>, vector<8x128xf32>,
    } else {
    }
    %c128_i32 = arith.constant 128 : i32
    %3 = arith.muli %arg1, %c128_i32 : i32
    %4 = tpu.assume_multiple %3, 128 : i32
    %c0 = arith.constant 0 : index
    %5 = arith.index_cast %4 : i32 to index
    %6 = vector.load %arg2[%c0, %5] : memref<8x128xf32, #tpu.memory_space<vmem>>, vector<8x128xf32>
    %c0_1 = arith.constant 0 : index
    %c0_2 = arith.constant 0 : index
    %7 = vector.load %arg6[%c0_1, %c0_2] : memref<8x128xf32, #tpu.memory_space<vmem>>, vector<8x128xf32>
    %c0_3 = arith.constant 0 : index
    %c0_4 = arith.constant 0 : index
    %8 = vector.load %arg3[%c0_3, %c0_4] : memref<128x128xf32, #tpu.memory_space<vmem>>, vector<128x128xf32>
    %cst = arith.constant dense<0.000000e+00> : vector<8x128xf32>
    %9 = tpu.matmul %6, %8, %cst {dimension_numbers = #tpu.dot_dimension_numbers<[1], [0], [0], [1], [0, 0, 1, 1], [], []>} : vector<8x128xf32>, vector<128x128xf32>, vector<8x128xf32> -> vector<8x128xf32>
    %10 = arith.addf %7, %9 : vector<8x128xf32>
    %c0_5 = arith.constant 0 : index
    %c0_6 = arith.constant 0 : index
    %11 = vector.load %arg6[%c0_5, %c0_6] : memref<8x128xf32, #tpu.memory_space<vmem>>, vector<8x128xf32>
    tpu.vector_store %arg6[%c0_5, %c0_6], %10 {strides = array<i32>} : memref<8x128xf32, #tpu.memory_space<vmem>>, vector<8x128xf32>,
    %c0_i32_7 = arith.constant 0 : i32
    %12 = arith.cmpi eq, %arg1, %c0_i32_7 : i32
    %13 = arith.extui %12 : i1 to i32
    %c0_i32_8 = arith.constant 0 : i32
    %14 = arith.cmpi ne, %13, %c0_i32_8 : i32
    scf.if %14 {
      %c0_9 = arith.constant 0 : index
      %c0_10 = arith.constant 0 : index
      %15 = vector.load %arg6[%c0_9, %c0_10] : memref<8x128xf32, #tpu.memory_space<vmem>>, vector<8x128xf32>
      %cst_11 = arith.constant dense<0.000000e+00> : vector<128xf32>
      %16 = vector.multi_reduction <add>, %15, %cst_11 [0] : vector<8x128xf32> to vector<128xf32>
      %17 = vector.shape_cast %16 : vector<128xf32> to vector<1x128xf32>
      %cst_12 = arith.constant 1.250000e-01 : f32
      %18 = vector.broadcast %cst_12 : f32 to vector<1x128xf32>
      %19 = arith.mulf %17, %18 : vector<1x128xf32>
      %20 = arith.mulf %15, %15 : vector<8x128xf32>
      %cst_13 = arith.constant dense<0.000000e+00> : vector<128xf32>
      %21 = vector.multi_reduction <add>, %20, %cst_13 [0] : vector<8x128xf32> to vector<128xf32>
      %22 = vector.shape_cast %21 : vector<128xf32> to vector<1x128xf32>
      %cst_14 = arith.constant 1.250000e-01 : f32
      %23 = vector.broadcast %cst_14 : f32 to vector<1x128xf32>
      %24 = arith.mulf %22, %23 : vector<1x128xf32>
      %25 = arith.mulf %19, %19 : vector<1x128xf32>
      %26 = arith.subf %24, %25 : vector<1x128xf32>
      %cst_15 = arith.constant 0.000000e+00 : f32
      %27 = vector.broadcast %cst_15 : f32 to vector<1x128xf32>
      %28 = arith.maximumf %26, %27 : vector<1x128xf32>
      %c0_16 = arith.constant 0 : index
      %c0_17 = arith.constant 0 : index
      %29 = vector.load %arg4[%c0_16, %c0_17] : memref<2x128xf32, #tpu.memory_space<vmem>>, vector<1x128xf32>
      %c1 = arith.constant 1 : index
      %c0_18 = arith.constant 0 : index
      %30 = vector.load %arg4[%c1, %c0_18] : memref<2x128xf32, #tpu.memory_space<vmem>>, vector<1x128xf32>
      %cst_19 = arith.constant 9.99999974E-6 : f32
      %31 = vector.broadcast %cst_19 : f32 to vector<1x128xf32>
      %32 = arith.addf %28, %31 : vector<1x128xf32>
      %33 = math.rsqrt %32 : vector<1x128xf32>
      %34 = arith.mulf %29, %33 : vector<1x128xf32>
      %35 = arith.mulf %19, %34 : vector<1x128xf32>
      %36 = arith.subf %30, %35 : vector<1x128xf32>
      %37 = vector.broadcast %34 : vector<1x128xf32> to vector<8x128xf32>
      %38 = arith.mulf %15, %37 : vector<8x128xf32>
      %39 = vector.broadcast %36 : vector<1x128xf32> to vector<8x128xf32>
      %40 = arith.addf %38, %39 : vector<8x128xf32>
      %cst_20 = arith.constant 0.000000e+00 : f32
      %41 = vector.broadcast %cst_20 : f32 to vector<8x128xf32>
      %42 = arith.maximumf %40, %41 : vector<8x128xf32>
      %c0_21 = arith.constant 0 : index
      %c0_22 = arith.constant 0 : index
      %43 = vector.load %arg5[%c0_21, %c0_22] : memref<8x128xf32, #tpu.memory_space<vmem>>, vector<8x128xf32>
      tpu.vector_store %arg5[%c0_21, %c0_22], %42 {strides = array<i32>} : memref<8x128xf32, #tpu.memory_space<vmem>>, vector<8x128xf32>,
    } else {
    }
    return
  }
  func.func @transform_0(%arg0: i32, %arg1: i32) -> (i32, i32) {
    %c0_i32 = arith.constant 0 : i32
    %c0_i32_0 = arith.constant 0 : i32
    %c0_i32_1 = arith.constant 0 : i32
    return %c0_i32, %c0_i32_0 : i32, i32
  }
  func.func @transform_1(%arg0: i32, %arg1: i32) -> (i32, i32) {
    %c0_i32 = arith.constant 0 : i32
    return %arg1, %arg0 : i32, i32
  }
  func.func @transform_2(%arg0: i32, %arg1: i32) -> (i32, i32) {
    %c0_i32 = arith.constant 0 : i32
    %c0_i32_0 = arith.constant 0 : i32
    return %c0_i32, %arg0 : i32, i32
  }
  func.func @transform_3(%arg0: i32, %arg1: i32) -> (i32, i32) {
    %c0_i32 = arith.constant 0 : i32
    %c0_i32_0 = arith.constant 0 : i32
    return %c0_i32, %arg0 : i32, i32
  }
}

</mosaic_0001>

<bundles_post_ra>
// kernel: forward.1
= control target key start
LH: loop header
LB: loop body
LE: loop exit
PB: predicated region body
PF: predicated region fallthrough
CT: control target
= control target key end

     0   :  { %8 = vsyncpa [#allocation4], 0  ;;  %s239_s0 = inlined_call_operand.vmem [shape: f32[8,128], index: 0, kind: input, shape index: {}]   ;;  %s240_s1 = inlined_call_operand.hbm [shape: f32[128,128], index: 1, kind: input, shape index: {}]   ;;  %s241_s2 = inlined_call_operand.vmem [shape: f32[2,128], index: 2, kind: input, shape index: {}]   ;;  %s242_s3 = inlined_call_operand.hbm [shape: f32[8,128], index: 3, kind: output, shape index: {}]  }
   0x1   :  { %9 = vsyncpa [#allocation5], 0  ;;  %s16_s14 = sshll.u32 %s240_s1, 4  ;;  %s200_s15 = smov [#allocation3]   ;;  %s17_s14 = int_to_ptr.hbm [resolvable:$true] %s16_s14 }
   0x2   :  { %s18_s16 = sshll.u32 %s200_s15, 4  ;;  %s201_s17 = smov 128   ;;  %s19_s16 = int_to_ptr.vmem [resolvable:$true] %s18_s16 }
   0x3   :  { %s202_s18 = smov 8  }
   0x4   :  { %24 = dma.hbm_to_vmem [thread:$0]  %s17_s14, 2048, %s19_s16, [#allocation4], %s201_s17, %s201_s17, %s202_s18  }
   0x5   :  { %196 = dma.done.wait [#allocation4], 2048  }
   0x6   :  { %197 = vsyncadd [#allocation4], 4294965248  ;;  %v57_v0 = vld [vmem:[#allocation3 + $0x78] sm:$0xff]  ;;  %v56_v1 = vld [vmem:[#allocation3 + $0x70] sm:$0xff]  ;;  %s203_s23 = smov [#allocation6]   ;;  %s131_s27 = sshll.u32 %s242_s3, 4  ;;  %s132_s27 = int_to_ptr.hbm [resolvable:$true] %s131_s27 }
   0x7   :  { %58 = vmatpush.msra.mxu0 %v57_v0  ;;  %v55_v2 = vld [vmem:[#allocation3 + $0x68] sm:$0xff]  ;;  %v54_v3 = vld [vmem:[#allocation3 + $0x60] sm:$0xff]  ;;  %v53_v4 = vld [vmem:[#allocation3 + $0x58] sm:$0xff]  ;;  %s129_s24 = sshll.u32 %s203_s23, 4  ;;  %s130_s24 = int_to_ptr.vmem [resolvable:$true] %s129_s24 }
   0x8   :  { %v52_v5 = vld [vmem:[#allocation3 + $0x50] sm:$0xff]  ;;  %v51_v6 = vld [vmem:[#allocation3 + $0x48] sm:$0xff]  ;;  %v50_v7 = vld [vmem:[#allocation3 + $0x40] sm:$0xff] }
   0x9   :  { %59 = vmatpush.msra.mxu0 %v56_v1  ;;  %v49_v8 = vld [vmem:[#allocation3 + $0x38] sm:$0xff]  ;;  %v48_v9 = vld [vmem:[#allocation3 + $0x30] sm:$0xff]  ;;  %v47_v10 = vld [vmem:[#allocation3 + $0x28] sm:$0xff] }
   0xa   :  { %v46_v11 = vld [vmem:[#allocation3 + $0x20] sm:$0xff]  ;;  %v45_v12 = vld [vmem:[#allocation3 + $0x18] sm:$0xff]  ;;  %v44_v13 = vld [vmem:[#allocation3 + $0x10] sm:$0xff] }
   0xb   :  { %60 = vmatpush.msra.mxu0 %v55_v2  ;;  %v43_v14 = vld [vmem:[#allocation3 + $0x8] sm:$0xff]  ;;  %v42_v15 = vld [vmem:[#allocation3] sm:$0xff] }
   0xc   :  { %v40_v16 = vld [vmem:[%s239_s0] sm:$0xff] }
   0xd   :  { %61 = vmatpush.msra.mxu0 %v54_v3  ;;  %v102_v42 = vld [vmem:[%s241_s2] sm:$0x1]  ;;  %v103_v46 = vld [vmem:[%s241_s2 + $0x1] sm:$0x1] }
   0xf   :  { %62 = vmatpush.msra.mxu0 %v53_v4 }
  0x11   :  { %63 = vmatpush.msra.mxu0 %v52_v5 }
  0x13   :  { %64 = vmatpush.msra.mxu0 %v51_v6 }
  0x15   :  { %65 = vmatpush.msra.mxu0 %v50_v7 }
  0x17   :  { %66 = vmatpush.msra.mxu0 %v49_v8 }
  0x19   :  { %67 = vmatpush.msra.mxu0 %v48_v9 }
  0x1b   :  { %68 = vmatpush.msra.mxu0 %v47_v10 }
  0x1d   :  { %69 = vmatpush.msra.mxu0 %v46_v11 }
  0x1f   :  { %70 = vmatpush.msra.mxu0 %v45_v12 }
  0x21   :  { %71 = vmatpush.msra.mxu0 %v44_v13 }
  0x23   :  { %72 = vmatpush.msra.mxu0 %v43_v14 }
  0x25   :  { %73 = vmatpush.msra.mxu0 %v42_v15 }
  0x26   :  { %74 = vmatmul.f32.vlgmr.msra.gmra.mxu0 %v40_v16 }
  0xa3   :  { %v75_v17 = vpop.f32.mrf.mxu0 }
  0xa4   :  { %v84_v18 = vrot.slane %v75_v17, 4  ;;  %v91_v19 = vmul.f32 %v75_v17, %v75_v17 }
  0xa6   :  { %v85_v20 = vadd.f32 %v84_v18, %v75_v17  ;;  %v92_v21 = vrot.slane %v91_v19, 4 }
  0xa8   :  { %v86_v22 = vrot.slane %v85_v20, 2  ;;  %v93_v23 = vadd.f32 %v92_v21, %v91_v19 }
  0xaa   :  { %v87_v24 = vadd.f32 %v86_v22, %v85_v20  ;;  %v94_v25 = vrot.slane %v93_v23, 2 }
  0xac   :  { %v88_v26 = vrot.slane %v87_v24, 1  ;;  %v95_v27 = vadd.f32 %v94_v25, %v93_v23 }
  0xae   :  { %v89_v28 = vadd.f32 %v88_v26, %v87_v24  ;;  %v96_v29 = vrot.slane %v95_v27, 1 }
  0xb0   :  { %v90_v30 = vmul.f32 0.125, %v89_v28  ;;  %v97_v31 = vadd.f32 %v96_v29, %v95_v27 }
  0xb2   :  { %v98_v32 = vmul.f32 0.125, %v97_v31  ;;  %v99_v33 = vmul.f32 %v90_v30, %v90_v30 }
  0xb4   :  { %v100_v34 = vsub.f32 %v98_v32, %v99_v33 }
  0xb6   :  { %v101_v35 = vmax.f32 %v100_v34, 0.0 }
  0xb8   :  { %v104_v36 = vadd.f32 1e-05, %v101_v35 }
  0xba   :  { %146 = vrsqrt.f32 %v104_v36  ;;  %vm111_vm1 = vweird.f32 %v104_v36 }
  0xc0   :  { %v147_v37 = vpop.eup %146 }
  0xc1   :  { %v106_v38 = vmul.f32 %v147_v37, %v104_v36  ;;  %vm112_vm0 = vweird.f32 %v147_v37 }
  0xc2   :  { %vm113_vm2 = vmor %vm111_vm1, %vm112_vm0 }
  0xc3   :  { %v107_v39 = vmul.f32 %v147_v37, %v106_v38 }
  0xc5   :  { %v108_v40 = vmul.f32 0.5, %v107_v39 }
  0xc7   :  { %v109_v41 = vsub.f32 1.5, %v108_v40 }
  0xc9   :  { %v110_v43 = vmul.f32 %v147_v37, %v109_v41 }
  0xcb   :  { %v114_v44 = vsel %vm113_vm2, %v147_v37, %v110_v43 }
  0xcc   :  { %v115_v45 = vmul.f32 %v114_v44, %v102_v42 }
  0xce   :  { %v116_v47 = vmul.f32 %v115_v45, %v90_v30  ;;  %v118_v48 = vperm.slane %v115_v45, 0 }
  0xd0   :  { %v117_v49 = vsub.f32 %v103_v46, %v116_v47  ;;  %v119_v50 = vmul.f32 %v118_v48, %v75_v17 }
  0xd2   :  { %v120_v51 = vperm.slane %v117_v49, 0 }
  0xd4   :  { %v121_v52 = vadd.f32 %v120_v51, %v119_v50 }
  0xd6   :  { %v122_v53 = vmax.f32 %v121_v52, 0.0 }
  0xd8   :  { %123 = vst [vmem:[#allocation6] sm:$0xff] %v122_v53 }
  0xd9   :  { %134 = dma.vmem_to_hbm [thread:$0]  %s130_s24, 128, %s132_s27, [#allocation5]  }
  0xda   :  { %198 = dma.done.wait [#allocation5], 128  }
  0xdb   :  { %199 = vsyncadd [#allocation5], 4294967168 }
  0xdc   :  { %139 = vsyncpa [#allocation4], 1 }
  0xdd   :  { %140 = vsyncpa [#allocation5], 1 }

</bundles_post_ra>
